<compile_context>
chip_gen: v7x
topology: tpu7x:2x2x1
jax: 0.10.0
libtpu: 0.0.40
codegen_flags: <defaults>
</compile_context>

<pallas_src>
import functools

import jax
import jax.numpy as jnp
from jax.experimental import pallas as pl
from jax.experimental.pallas import tpu as pltpu

LANE = 128
SUBLANE = 8
MAX_BATCH_TILE = 512


def _round_up(n, m):
    return ((n + m - 1) // m) * m


def _pick_batch_tile(b_pad, max_tile=MAX_BATCH_TILE):
    """Largest multiple-of-8 divisor of b_pad (<= max_tile), preferring >=2 grid steps."""
    divisors = [t for t in range(SUBLANE, min(max_tile, b_pad) + 1, SUBLANE)
                if b_pad % t == 0]
    multi = [t for t in divisors if b_pad // t >= 2]
    return max(multi) if multi else max(divisors)


def _encoder_kernel(x_ref, w1_ref, b1_ref, w2_ref, b2_ref, z_ref):
    # Layer 1: bf16 MXU feed, f32 accumulate, f32 epilogue.
    h = jnp.dot(x_ref[...], w1_ref[...], preferred_element_type=jnp.float32)
    h = jnp.maximum(h + b1_ref[...], 0.0)

    # Layer 2: re-quantize activations to the weight dtype (bf16) for the MXU,
    # accumulate in f32, f32 epilogue.
    z = jnp.dot(h.astype(w2_ref.dtype), w2_ref[...],
                preferred_element_type=jnp.float32)
    z = jnp.maximum(z + b2_ref[...], 0.0)

    z_ref[...] = z.astype(z_ref.dtype)


@functools.partial(jax.jit, static_argnames=("hidden_dim_2",))
def encoder_forward(x, params, *, hidden_dim_2):
    """Fused encoder forward. Returns z with shape (B, hidden_dim_2), f32."""
    B, in_dim = x.shape
    w1, b1, w2, b2 = params["w1"], params["b1"], params["w2"], params["b2"]
    in_pad, hid_pad = w1.shape
    hid2_pad = w2.shape[1]
    compute_dtype = w1.dtype

    # Batch padding (multiple of 8 sublanes) decoupled from the tile size.
    b_pad = _round_up(B, SUBLANE)
    tb = _pick_batch_tile(b_pad)

    # Pad / cast the input only when the static shapes / dtype require it.
    if B == b_pad and in_dim == in_pad:
        x_in = x if x.dtype == compute_dtype else x.astype(compute_dtype)
    else:
        x_in = (jnp.zeros((b_pad, in_pad), compute_dtype)
                .at[:B, :in_dim].set(x.astype(compute_dtype)))

    grid = (b_pad // tb,)

    # VMEM budget from the actual footprint (weights double-buffered by default,
    # x/z tiles double-buffered, f32 intermediates), with 2x headroom,
    # clamped to [16 MiB, 64 MiB] so it is valid on v5e/v6e/v7x.
    weight_bytes = sum(int(a.size) * a.dtype.itemsize for a in (w1, b1, w2, b2))
    io_tile_bytes = tb * in_pad * w1.dtype.itemsize + tb * hid2_pad * 4
    scratch_bytes = tb * hid_pad * 4 + tb * hid2_pad * 4
    footprint = 2 * weight_bytes + 2 * io_tile_bytes + scratch_bytes
    vmem_limit = int(min(max(2 * footprint, 16 * 1024 * 1024), 64 * 1024 * 1024))

    flops = 2 * b_pad * (in_pad * hid_pad + hid_pad * hid2_pad)
    bytes_accessed = (int(x_in.size) * x_in.dtype.itemsize
                      + weight_bytes
                      + b_pad * hid2_pad * 4)

    in_specs = [
        pl.BlockSpec((tb, in_pad), lambda i: (i, 0)),          # x: tiled on batch
        pl.BlockSpec((in_pad, hid_pad), lambda i: (0, 0)),     # w1: VMEM-resident
        pl.BlockSpec((1, hid_pad), lambda i: (0, 0)),          # b1: VMEM-resident
        pl.BlockSpec((hid_pad, hid2_pad), lambda i: (0, 0)),   # w2: VMEM-resident
        pl.BlockSpec((1, hid2_pad), lambda i: (0, 0)),         # b2: VMEM-resident
    ]
    out_specs = pl.BlockSpec((tb, hid2_pad), lambda i: (i, 0))

    z_pad = pl.pallas_call(
        _encoder_kernel,
        out_shape=jax.ShapeDtypeStruct((b_pad, hid2_pad), jnp.float32),
        grid=grid,
        in_specs=in_specs,
        out_specs=out_specs,
        compiler_params=pltpu.CompilerParams(
            dimension_semantics=("parallel",),
            vmem_limit_bytes=vmem_limit,
        ),
        cost_estimate=pl.CostEstimate(
            flops=flops, transcendentals=0, bytes_accessed=bytes_accessed),
    )(x_in, w1, b1, w2, b2)

    # Strip batch / lane padding only if there is any.
    if B == b_pad and hidden_dim_2 == hid2_pad:
        return z_pad
    return z_pad[:B, :hidden_dim_2]


def init_params(key, input_dim, hidden_dim, hidden_dim_2, lane=LANE,
                weight_dtype=jnp.bfloat16):
    """Deterministic synthetic params, zero-padded to `lane` multiples.

    Weights are stored as (in, out) = W_pytorch.T (bf16); biases stay f32.
    Zero padding is numerically inert through Linear+ReLU.
    """
    in_pad = _round_up(input_dim, lane)
    hid_pad = _round_up(hidden_dim, lane)
    hid2_pad = _round_up(hidden_dim_2, lane)

    keys = jax.random.split(key, 4)

    def lin(kw, kb, fan_in, fan_out, fan_in_pad, fan_out_pad):
        bound = 1.0 / (fan_in ** 0.5)   # PyTorch default Linear init scale
        w = jax.random.uniform(kw, (fan_in, fan_out), jnp.float32, -bound, bound)
        b = jax.random.uniform(kb, (1, fan_out), jnp.float32, -bound, bound)
        w_pad = (jnp.zeros((fan_in_pad, fan_out_pad), weight_dtype)
                 .at[:fan_in, :fan_out].set(w.astype(weight_dtype)))
        b_pad = jnp.zeros((1, fan_out_pad), jnp.float32).at[:, :fan_out].set(b)
        return w_pad, b_pad

    w1_pad, b1_pad = lin(keys[0], keys[1], input_dim, hidden_dim, in_pad, hid_pad)
    w2_pad, b2_pad = lin(keys[2], keys[3], hidden_dim, hidden_dim_2, hid_pad, hid2_pad)
    return dict(w1=w1_pad, b1=b1_pad, w2=w2_pad, b2=b2_pad)


def encoder_reference(x, params, hidden_dim_2):
    """Pure-JAX reference mirroring the kernel's bf16-feed / f32-accumulate numerics."""
    in_pad = params["w1"].shape[0]
    B, in_dim = x.shape
    x_pad = jnp.zeros((B, in_pad), jnp.float32).at[:, :in_dim].set(x)
    xq = x_pad.astype(params["w1"].dtype).astype(jnp.float32)
    w1 = params["w1"].astype(jnp.float32)
    w2 = params["w2"].astype(jnp.float32)
    h = jnp.maximum(xq @ w1 + params["b1"], 0.0)
    hq = h.astype(params["w2"].dtype).astype(jnp.float32)
    z = jnp.maximum(hq @ w2 + params["b2"], 0.0)
    return z[:, :hidden_dim_2]


if __name__ == "__main__":
    B, input_dim, hidden_dim, hidden_dim_2 = 8, 16, 32, 16

    key = jax.random.PRNGKey(0)
    k_x, k_p = jax.random.split(key, 2)
    x = jax.random.normal(k_x, (B, input_dim), jnp.float32)
    params = init_params(k_p, input_dim, hidden_dim, hidden_dim_2)

    z = jax.block_until_ready(encoder_forward(x, params, hidden_dim_2=hidden_dim_2))

    z_ref = encoder_reference(x, params, hidden_dim_2)
    assert z.shape == (B, hidden_dim_2)
    assert jnp.allclose(z, z_ref, atol=1e-3, rtol=1e-3), float(jnp.abs(z - z_ref).max())

    print("KERNEL_OK")
</pallas_src>

<mosaic_0001>
module attributes {stable_mosaic.version = 11 : i64} {
  func.func @_encoder_kernel(%arg0: i32, %arg1: memref<8x128xbf16, #tpu.memory_space<vmem>>, %arg2: memref<128x128xbf16, #tpu.memory_space<vmem>>, %arg3: memref<1x128xf32, #tpu.memory_space<vmem>>, %arg4: memref<128x128xbf16, #tpu.memory_space<vmem>>, %arg5: memref<1x128xf32, #tpu.memory_space<vmem>>, %arg6: memref<8x128xf32, #tpu.memory_space<vmem>>) attributes {dimension_semantics = [#tpu.dimension_semantics<parallel>], iteration_bounds = array<i64: 1>, scalar_prefetch = 0 : i64, scratch_operands = 0 : i64, tpu.core_type = #tpu.core_type<tc>, window_params = [{transform_indices = @transform_0, window_bounds = array<i64: 8, 128>}, {pipeline_mode = #tpu.pipeline_mode<synchronous>, transform_indices = @transform_1, window_bounds = array<i64: 128, 128>}, {pipeline_mode = #tpu.pipeline_mode<synchronous>, transform_indices = @transform_2, window_bounds = array<i64: 1, 128>}, {pipeline_mode = #tpu.pipeline_mode<synchronous>, transform_indices = @transform_3, window_bounds = array<i64: 128, 128>}, {pipeline_mode = #tpu.pipeline_mode<synchronous>, transform_indices = @transform_4, window_bounds = array<i64: 1, 128>}, {transform_indices = @transform_5, window_bounds = array<i64: 8, 128>}]} {
    %c0 = arith.constant 0 : index
    %c0_0 = arith.constant 0 : index
    %0 = vector.load %arg1[%c0, %c0_0] : memref<8x128xbf16, #tpu.memory_space<vmem>>, vector<8x128xbf16>
    %c0_1 = arith.constant 0 : index
    %c0_2 = arith.constant 0 : index
    %1 = vector.load %arg2[%c0_1, %c0_2] : memref<128x128xbf16, #tpu.memory_space<vmem>>, vector<128x128xbf16>
    %cst = arith.constant dense<0.000000e+00> : vector<8x128xf32>
    %2 = tpu.matmul %0, %1, %cst {dimension_numbers = #tpu.dot_dimension_numbers<[1], [0], [0], [1], [0, 0, 1, 1], [], []>} : vector<8x128xbf16>, vector<128x128xbf16>, vector<8x128xf32> -> vector<8x128xf32>
    %c0_3 = arith.constant 0 : index
    %c0_4 = arith.constant 0 : index
    %3 = vector.load %arg3[%c0_3, %c0_4] : memref<1x128xf32, #tpu.memory_space<vmem>>, vector<1x128xf32>
    %4 = vector.broadcast %3 : vector<1x128xf32> to vector<8x128xf32>
    %5 = arith.addf %2, %4 : vector<8x128xf32>
    %cst_5 = arith.constant 0.000000e+00 : f32
    %6 = vector.broadcast %cst_5 : f32 to vector<8x128xf32>
    %7 = arith.maximumf %5, %6 : vector<8x128xf32>
    %8 = arith.truncf %7 : vector<8x128xf32> to vector<8x128xbf16>
    %c0_6 = arith.constant 0 : index
    %c0_7 = arith.constant 0 : index
    %9 = vector.load %arg4[%c0_6, %c0_7] : memref<128x128xbf16, #tpu.memory_space<vmem>>, vector<128x128xbf16>
    %cst_8 = arith.constant dense<0.000000e+00> : vector<8x128xf32>
    %10 = tpu.matmul %8, %9, %cst_8 {dimension_numbers = #tpu.dot_dimension_numbers<[1], [0], [0], [1], [0, 0, 1, 1], [], []>} : vector<8x128xbf16>, vector<128x128xbf16>, vector<8x128xf32> -> vector<8x128xf32>
    %c0_9 = arith.constant 0 : index
    %c0_10 = arith.constant 0 : index
    %11 = vector.load %arg5[%c0_9, %c0_10] : memref<1x128xf32, #tpu.memory_space<vmem>>, vector<1x128xf32>
    %12 = vector.broadcast %11 : vector<1x128xf32> to vector<8x128xf32>
    %13 = arith.addf %10, %12 : vector<8x128xf32>
    %cst_11 = arith.constant 0.000000e+00 : f32
    %14 = vector.broadcast %cst_11 : f32 to vector<8x128xf32>
    %15 = arith.maximumf %13, %14 : vector<8x128xf32>
    %c0_12 = arith.constant 0 : index
    %c0_13 = arith.constant 0 : index
    %16 = vector.load %arg6[%c0_12, %c0_13] : memref<8x128xf32, #tpu.memory_space<vmem>>, vector<8x128xf32>
    tpu.vector_store %arg6[%c0_12, %c0_13], %15 {strides = array<i32>} : memref<8x128xf32, #tpu.memory_space<vmem>>, vector<8x128xf32>,
    return
  }
  func.func @transform_0(%arg0: i32) -> (i32, i32) {
    %c0_i32 = arith.constant 0 : i32
    %c0_i32_0 = arith.constant 0 : i32
    return %arg0, %c0_i32 : i32, i32
  }
  func.func @transform_1(%arg0: i32) -> (i32, i32) {
    %c0_i32 = arith.constant 0 : i32
    %c0_i32_0 = arith.constant 0 : i32
    %c0_i32_1 = arith.constant 0 : i32
    return %c0_i32, %c0_i32_0 : i32, i32
  }
  func.func @transform_2(%arg0: i32) -> (i32, i32) {
    %c0_i32 = arith.constant 0 : i32
    %c0_i32_0 = arith.constant 0 : i32
    %c0_i32_1 = arith.constant 0 : i32
    return %c0_i32, %c0_i32_0 : i32, i32
  }
  func.func @transform_3(%arg0: i32) -> (i32, i32) {
    %c0_i32 = arith.constant 0 : i32
    %c0_i32_0 = arith.constant 0 : i32
    %c0_i32_1 = arith.constant 0 : i32
    return %c0_i32, %c0_i32_0 : i32, i32
  }
  func.func @transform_4(%arg0: i32) -> (i32, i32) {
    %c0_i32 = arith.constant 0 : i32
    %c0_i32_0 = arith.constant 0 : i32
    %c0_i32_1 = arith.constant 0 : i32
    return %c0_i32, %c0_i32_0 : i32, i32
  }
  func.func @transform_5(%arg0: i32) -> (i32, i32) {
    %c0_i32 = arith.constant 0 : i32
    %c0_i32_0 = arith.constant 0 : i32
    return %arg0, %c0_i32 : i32, i32
  }
}

</mosaic_0001>

<bundles_post_ra>
// kernel: encoder_forward.1
= control target key start
LH: loop header
LB: loop body
LE: loop exit
PB: predicated region body
PF: predicated region fallthrough
CT: control target
= control target key end

     0   :  { %10 = vsyncpa [#allocation3], 0  ;;  %s546_s0 = inlined_call_operand.vmem [shape: bf16[8,128], index: 0, kind: input, shape index: {}]   ;;  %s547_s1 = inlined_call_operand.hbm [shape: bf16[128,128], index: 1, kind: input, shape index: {}]   ;;  %s548_s2 = inlined_call_operand.vmem [shape: f32[1,128], index: 2, kind: input, shape index: {}]   ;;  %s549_s3 = inlined_call_operand.hbm [shape: bf16[128,128], index: 3, kind: input, shape index: {}]   ;;  %s550_s4 = inlined_call_operand.vmem [shape: f32[1,128], index: 4, kind: input, shape index: {}]   ;;  %s551_s5 = inlined_call_operand.hbm [shape: f32[8,128], index: 5, kind: output, shape index: {}]  }
   0x1   :  { %11 = vsyncpa [#allocation6], 0 }
   0x2   :  { %12 = vsyncpa [#allocation4], 0  ;;  %s464_s18 = smov [#allocation2]   ;;  %s392_s22 = scalar_lea.hbm %s547_s1, 1024 }
   0x3   :  { %s20_s19 = sshll.u32 %s464_s18, 4  ;;  %p393_p0 = scmp.ne.s32.totalorder %s547_s1, %s392_s22  ;;  %s21_s19 = int_to_ptr.vmem [resolvable:$true] %s20_s19 }
   0x4   :  { %p396_p1 = scmp.lt.u32.totalorder %s392_s22, %s547_s1 }
   0x6   :  { %p398_p2 = pnand %p396_p1, %p393_p0 }
   0x8   :  { %401 = shalt.err (!%p398_p2)
}
   0x9   :  { %s402_s27 = scalar_lea.vmem %s21_s19, 1024  ;;  %p407_p4 = scmp.lt.s32.totalorder %s21_s19, %s21_s19 }
   0xa   :  { %p403_p3 = scmp.ne.s32.totalorder %s21_s19, %s402_s27  ;;  %p408_p5 = scmp.lt.s32.totalorder %s402_s27, %s402_s27 }
   0xc   :  { %p409_p6 = por %p408_p5, %p407_p4 }
   0xe   :  { %p410_p7 = pnand %p409_p6, %p403_p3 }
  0x10   :  { %413 = shalt.err (!%p410_p7)
}
  0x11   :  { %s465_s28 = smov 64   ;;  %s466_s29 = smov 4  }
  0x12   :  { %26 = dma.hbm_to_vmem [thread:$0]  %s547_s1, 1024, %s21_s19, [#allocation3], %s465_s28, %s465_s28, %s466_s29  }
  0x13   :  { %s467_s7 = smov [#allocation5]   ;;  %s414_s11 = scalar_lea.hbm %s549_s3, 1024 }
  0x14   :  { %s34_s8 = sshll.u32 %s467_s7, 4  ;;  %p415_p8 = scmp.ne.s32.totalorder %s549_s3, %s414_s11  ;;  %s35_s8 = int_to_ptr.vmem [resolvable:$true] %s34_s8 }
  0x15   :  { %p418_p9 = scmp.lt.u32.totalorder %s414_s11, %s549_s3 }
  0x17   :  { %p420_p10 = pnand %p418_p9, %p415_p8 }
  0x19   :  { %423 = shalt.err (!%p420_p10)
}
  0x1a   :  { %s424_s16 = scalar_lea.vmem %s35_s8, 1024  ;;  %p429_p12 = scmp.lt.s32.totalorder %s35_s8, %s35_s8 }
  0x1b   :  { %p425_p11 = scmp.ne.s32.totalorder %s35_s8, %s424_s16  ;;  %p430_p13 = scmp.lt.s32.totalorder %s424_s16, %s424_s16 }
  0x1d   :  { %p431_p0 = por %p430_p13, %p429_p12 }
  0x1f   :  { %p432_p1 = pnand %p431_p0, %p425_p11 }
  0x21   :  { %435 = shalt.err (!%p432_p1)
}
  0x22   :  { %40 = dma.hbm_to_vmem [thread:$0]  %s549_s3, 1024, %s35_s8, [#allocation6], %s465_s28, %s465_s28, %s466_s29  }
  0x23   :  { %458 = dma.done.wait [#allocation3], 1024  }
  0x24   :  { %459 = vsyncadd [#allocation3], 4294966272 }
  0x25   :  { %460 = dma.done.wait [#allocation6], 1024  }
  0x26   :  { %461 = vsyncadd [#allocation6], 4294966272  ;;  %v468_v0 = vmov 0.0   ;;  %vm469_vm0 = vmmov 0   ;;  %v376_v1 = vld [vmem:[#allocation2] sm:$0xff]   ;;  %v377_v2 = vld [vmem:[#allocation2 + $0x8] sm:$0xff]  }
  0x27   :  { %329 = vmatprep.subr.bf16.mxu0 %v468_v0  ;;  %345 = vmatprep.mubr.msk.bf16.mxu0 %vm469_vm0, %v468_v0  ;;  %v378_v3 = vld [vmem:[#allocation2 + $0x10] sm:$0xff]   ;;  %v384_v4 = vld [vmem:[#allocation5] sm:$0xff]   ;;  %v379_v5 = vld [vmem:[#allocation2 + $0x18] sm:$0xff]   ;;  %s470_s22 = smov [#allocation7]  }
  0x28   :  { %349 = vmatprep.subr.bf16.mxu1 %v468_v0  ;;  %365 = vmatprep.mubr.msk.bf16.mxu1 %vm469_vm0, %v468_v0  ;;  %v385_v6 = vld [vmem:[#allocation5 + $0x8] sm:$0xff]   ;;  %v380_v7 = vld [vmem:[#allocation2 + $0x20] sm:$0xff]   ;;  %v386_v8 = vld [vmem:[#allocation5 + $0x10] sm:$0xff]   ;;  %s283_s23 = sshll.u32 %s470_s22, 4  ;;  %s284_s23 = int_to_ptr.vmem [resolvable:$true] %s283_s23 }
  0x29   :  { %330 = vmatpush3.bf16.msra.mxu0 %v376_v1  ;;  %350 = vmatpush3.bf16.msra.mxu1 %v384_v4  ;;  %v381_v9 = vld [vmem:[#allocation2 + $0x28] sm:$0xff]   ;;  %v387_v10 = vld [vmem:[#allocation5 + $0x18] sm:$0xff]   ;;  %v382_v11 = vld [vmem:[#allocation2 + $0x30] sm:$0xff]   ;;  %p441_p3 = scmp.lt.s32.totalorder %s284_s23, %s284_s23 }
  0x2a   :  { %331 = vmatprep.subr.bf16.mxu0 %v468_v0  ;;  %351 = vmatprep.subr.bf16.mxu1 %v468_v0  ;;  %v388_v12 = vld [vmem:[#allocation5 + $0x20] sm:$0xff]   ;;  %v383_v13 = vld [vmem:[#allocation2 + $0x38] sm:$0xff]   ;;  %v389_v14 = vld [vmem:[#allocation5 + $0x28] sm:$0xff]  }
  0x2b   :  { %v50_v15 = vld [vmem:[%s546_s0] sm:$0xf]  ;;  %v390_v16 = vld [vmem:[#allocation5 + $0x30] sm:$0xff]   ;;  %v391_v17 = vld [vmem:[#allocation5 + $0x38] sm:$0xff]  }
  0x2c   :  { %v293_v18 = vld [vmem:[%s548_s2] ss:$0 sm:$0xff]  ;;  %s436_s2 = scalar_lea.vmem %s284_s23, 128 }
  0x2d   :  { %332 = vmatpush3.bf16.msra.mxu0 %v377_v2  ;;  %352 = vmatpush3.bf16.msra.mxu1 %v385_v6  ;;  %v302_v26 = vld [vmem:[%s550_s4] ss:$0 sm:$0xff]  ;;  %p437_p2 = scmp.ne.s32.totalorder %s284_s23, %s436_s2  ;;  %p442_p4 = scmp.lt.s32.totalorder %s436_s2, %s436_s2 }
  0x2e   :  { %333 = vmatprep.subr.bf16.mxu0 %v468_v0  ;;  %353 = vmatprep.subr.bf16.mxu1 %v468_v0 }
  0x2f   :  { %p443_p5 = por %p442_p4, %p441_p3 }
  0x31   :  { %334 = vmatpush3.bf16.msra.mxu0 %v378_v3  ;;  %354 = vmatpush3.bf16.msra.mxu1 %v386_v8  ;;  %p444_p6 = pnand %p443_p5, %p437_p2 }
  0x32   :  { %335 = vmatprep.subr.bf16.mxu0 %v468_v0  ;;  %355 = vmatprep.subr.bf16.mxu1 %v468_v0 }
  0x35   :  { %336 = vmatpush3.bf16.msra.mxu0 %v379_v5  ;;  %356 = vmatpush3.bf16.msra.mxu1 %v387_v10 }
  0x36   :  { %337 = vmatprep.subr.bf16.mxu0 %v468_v0  ;;  %357 = vmatprep.subr.bf16.mxu1 %v468_v0 }
  0x39   :  { %338 = vmatpush3.bf16.msra.mxu0 %v380_v7  ;;  %358 = vmatpush3.bf16.msra.mxu1 %v388_v12 }
  0x3a   :  { %339 = vmatprep.subr.bf16.mxu0 %v468_v0  ;;  %359 = vmatprep.subr.bf16.mxu1 %v468_v0 }
  0x3d   :  { %340 = vmatpush3.bf16.msra.mxu0 %v381_v9  ;;  %360 = vmatpush3.bf16.msra.mxu1 %v389_v14 }
  0x3e   :  { %341 = vmatprep.subr.bf16.mxu0 %v468_v0  ;;  %361 = vmatprep.subr.bf16.mxu1 %v468_v0 }
  0x41   :  { %342 = vmatpush3.bf16.msra.mxu0 %v382_v11  ;;  %362 = vmatpush3.bf16.msra.mxu1 %v390_v16 }
  0x42   :  { %343 = vmatprep.subr.bf16.mxu0 %v468_v0  ;;  %363 = vmatprep.subr.bf16.mxu1 %v468_v0 }
  0x45   :  { %344 = vmatpush3.bf16.msra.mxu0 %v383_v13  ;;  %364 = vmatpush3.bf16.msra.mxu1 %v391_v17 }
  0x48   :  { %346 = vmatmul.mubr.bf16.vlgmr.msra.gmra.mrb[0].mxu0 %v50_v15 }
 0x11b   :  { %v156_v19 = vpop.f32.mrb[0].mxu0 }
 0x11c   :  { %v157_v20 = vadd.f32 %v293_v18, %v156_v19  ;;  %v347_v21 = vpop.f32.mrb[1].mxu0 }
 0x11d   :  { %v159_v22 = vpop.f32.mrb[2].mxu0 }
 0x11e   :  { %v162_v23 = vmax.f32 %v157_v20, 0.0  ;;  %v348_v24 = vpop.f32.mrb[3].mxu0 }
 0x120   :  { %v163_v25 = vpack.c.bf16 %v162_v23, %v162_v23 }
 0x122   :  { %366 = vmatmul.mubr.bf16.vlgmr.msra.gmra.mrb[0].mxu1 %v163_v25 }
 0x1f5   :  { %v269_v27 = vpop.f32.mrb[0].mxu1 }
 0x1f6   :  { %v270_v28 = vadd.f32 %v302_v26, %v269_v27  ;;  %v367_v29 = vpop.f32.mrb[1].mxu1 }
 0x1f7   :  { %v272_v30 = vpop.f32.mrb[2].mxu1 }
 0x1f8   :  { %v275_v31 = vmax.f32 %v270_v28, 0.0  ;;  %v368_v32 = vpop.f32.mrb[3].mxu1 }
 0x1fa   :  { %276 = vst [vmem:[#allocation7] sm:$0xff] %v275_v31 }
 0x1fb   :  { %447 = shalt.err (!%p444_p6)
}
 0x1fc   :  { %s448_s4 = scalar_lea.hbm %s551_s5, 128 }
 0x1fd   :  { %p449_p7 = scmp.ne.s32.totalorder %s551_s5, %s448_s4  ;;  %p452_p8 = scmp.lt.u32.totalorder %s448_s4, %s551_s5 }
 0x1ff   :  { %p454_p9 = pnand %p452_p8, %p449_p7 }
 0x201   :  { %457 = shalt.err (!%p454_p9)
}
 0x202   :  { %286 = dma.vmem_to_hbm [thread:$0]  %s284_s23, 128, %s551_s5, [#allocation4]  }
 0x203   :  { %462 = dma.done.wait [#allocation4], 128  }
 0x204   :  { %463 = vsyncadd [#allocation4], 4294967168 }
 0x205   :  { %290 = vsyncpa [#allocation3], 1 }
 0x206   :  { %291 = vsyncpa [#allocation6], 1 }
 0x207   :  { %292 = vsyncpa [#allocation4], 1 }

</bundles_post_ra>
